<compile_context>
chip_gen: v7x
topology: tpu7x:2x2x1
jax: 0.10.0
libtpu: 0.0.40
codegen_flags: <defaults>
</compile_context>

<pallas_src>
import jax
import jax.numpy as jnp
from jax.experimental import pallas as pl
from jax.experimental.pallas import tpu as pltpu


# ---------------------------------------------------------------------------
# Kernels: each grid step reduces a (TB, TH, W) tile to 4 scalars and writes
# them into lanes 0..3 of its own lane-dense (1, 1, 8, 128) partial block.
#   lane 0: sum |dy| * wy   lane 1: sum |dx| * wx
#   lane 2: sum wy          lane 3: sum wx
# ---------------------------------------------------------------------------
def _tv_partials_weighted_kernel(pred_ref, w_ref, out_ref):
    p = pred_ref[...]                                  # (TB, TH, W), input dtype
    w = w_ref[...].astype(jnp.float32)                 # (TB, TH, W)

    # Neighbor diffs in the input dtype (bf16 stays packed on the VPU),
    # widened to f32 only for the weighted multiply / accumulation.
    dy = jnp.abs(p[:, :-1, :] - p[:, 1:, :]).astype(jnp.float32)   # (TB, TH-1, W)
    dx = jnp.abs(p[:, :, :-1] - p[:, :, 1:]).astype(jnp.float32)   # (TB, TH, W-1)

    wy = w[:, :-1, :]
    wx = w[:, :, :-1]

    sy = jnp.sum(dy * wy)
    sx = jnp.sum(dx * wx)
    swy = jnp.sum(wy)
    swx = jnp.sum(wx)

    lane = jax.lax.broadcasted_iota(jnp.int32, (8, 128), 1)
    out_ref[0, 0, :, :] = (jnp.where(lane == 0, sy, 0.0)
                           + jnp.where(lane == 1, sx, 0.0)
                           + jnp.where(lane == 2, swy, 0.0)
                           + jnp.where(lane == 3, swx, 0.0))


def _tv_partials_kernel(pred_ref, out_ref):
    # weight=None fast path: single input stream, no weight sums needed.
    p = pred_ref[...]                                  # (TB, TH, W), input dtype

    sy = jnp.sum(jnp.abs(p[:, :-1, :] - p[:, 1:, :]).astype(jnp.float32))
    sx = jnp.sum(jnp.abs(p[:, :, :-1] - p[:, :, 1:]).astype(jnp.float32))

    lane = jax.lax.broadcasted_iota(jnp.int32, (8, 128), 1)
    out_ref[0, 0, :, :] = (jnp.where(lane == 0, sy, 0.0)
                           + jnp.where(lane == 1, sx, 0.0))


# ---------------------------------------------------------------------------
# Tile selection.  TB always divides P (= N*C) and TH always divides H (and is
# sublane-aligned or the full H), so blocks tile the arrays exactly -> no
# jnp.pad HBM copy and no in-kernel masking of ragged blocks.
# ---------------------------------------------------------------------------
def _largest_divisor_leq(n, cap):
    cap = int(max(1, min(n, cap)))
    for d in range(cap, 0, -1):
        if n % d == 0:
            return d
    return 1


def _largest_h_tile(h, cap, align):
    """Largest TH <= cap with TH | h and (TH == h or TH % align == 0)."""
    cap = int(max(1, min(h, cap)))
    for d in range(cap, 0, -1):
        if h % d == 0 and (d == h or d % align == 0):
            return d
    return h  # no aligned divisor -> fall back to the full plane (no H tiling)


def _choose_tiles(num_planes, h, w, itemsize, budget_bytes,
                  min_steps=4, min_block_bytes=256 << 10):
    """Pick (TB, TH).  budget/min_block are in f32-equivalent bytes so the
    in-kernel f32 temporaries stay bounded regardless of the input dtype."""
    align = max(8, 32 // max(1, itemsize))          # sublane alignment for TH
    max_elems = max(1, budget_bytes // 4)

    if h * w <= max_elems:
        th = h
    else:
        th = _largest_h_tile(h, max_elems // max(1, w), align)
    tb = _largest_divisor_leq(num_planes, max(1, max_elems // max(1, th * w)))

    # Keep a handful of grid steps for double-buffering / megacore as long as
    # blocks stay reasonably large.
    while (num_planes // tb) * (h // th) < min_steps:
        shrunk = False
        if tb > 1:
            cand = _largest_divisor_leq(num_planes, tb - 1)
            if cand < tb and cand * th * w * 4 >= min_block_bytes:
                tb, shrunk = cand, True
        if not shrunk and th > 1:
            cand = _largest_h_tile(h, th - 1, align)
            if cand < th and tb * cand * w * 4 >= min_block_bytes:
                th, shrunk = cand, True
        if not shrunk:
            break
    return tb, th


def weighted_tv_loss(pred, weight=None, loss_weight=1.0, reduction="mean", *,
                     budget_bytes=4 << 20, min_block_bytes=256 << 10):
    """Matches basicsr.losses.basic_loss.WeightedTVLoss.forward semantics.

    pred:   (N, C, H, W)
    weight: optional (N, C, H, W) element-wise weights.
    """
    if reduction not in ("mean", "sum"):
        raise ValueError("Unsupported reduction mode: mean | sum only")

    N, C, H, W = pred.shape
    P = N * C
    itemsize = jnp.dtype(pred.dtype).itemsize
    weighted = weight is not None

    TB, TH = _choose_tiles(P, H, W, itemsize, budget_bytes,
                           min_block_bytes=min_block_bytes)
    G_p, G_h = P // TB, H // TH

    pred_p = pred.reshape(P, H, W)
    args = [pred_p]
    if weighted:
        weight_p = weight.reshape(P, H, W)
        args.append(weight_p)
    n_in = len(args)

    in_specs = [pl.BlockSpec((TB, TH, W), lambda i, j: (i, j, 0)) for _ in args]
    out_specs = pl.BlockSpec((1, 1, 8, 128), lambda i, j: (i, j, 0, 0))

    # VMEM: 2 pipeline buffers per input + the f32 temporaries the body makes.
    block_elems = TB * TH * W
    vmem_est = (2 * n_in * block_elems * itemsize
                + (5 if weighted else 3) * block_elems * 4
                + (2 << 20))
    vmem_limit = int(min(48 << 20, max(32 << 20, vmem_est)))  # 48 MiB cap: v7x headroom

    kernel = _tv_partials_weighted_kernel if weighted else _tv_partials_kernel

    partials = pl.pallas_call(
        kernel,
        out_shape=jax.ShapeDtypeStruct((G_p, G_h, 8, 128), jnp.float32),
        grid=(G_p, G_h),
        in_specs=in_specs,
        out_specs=out_specs,
        compiler_params=pltpu.CompilerParams(
            dimension_semantics=("parallel", "parallel"),
            vmem_limit_bytes=vmem_limit,
        ),
        cost_estimate=pl.CostEstimate(
            flops=(8 if weighted else 5) * P * H * W,
            transcendentals=0,
            bytes_accessed=n_in * P * H * W * itemsize + G_p * G_h * 8 * 128 * 4,
        ),
    )(*args)

    # Reduce the tiny per-block partial slab in f32 in the glue.
    totals = jnp.sum(partials[:, :, 0, :], axis=(0, 1))          # (128,)
    sum_y, sum_x = totals[0], totals[1]
    sum_wy, sum_wx = totals[2], totals[3]

    # Row pairs straddling H-tile boundaries: O(P * (G_h-1) * W) extra work,
    # done on a cheap strided slice in plain JAX (negligible HBM traffic).
    if G_h > 1:
        upper = pred_p[:, TH - 1:H - 1:TH, :]
        lower = pred_p[:, TH:H:TH, :]
        bdy = jnp.abs(upper - lower).astype(jnp.float32)
        if weighted:
            w_up = weight_p[:, TH - 1:H - 1:TH, :].astype(jnp.float32)
            sum_y = sum_y + jnp.sum(bdy * w_up)
            sum_wy = sum_wy + jnp.sum(w_up)
        else:
            sum_y = sum_y + jnp.sum(bdy)

    if reduction == "mean":
        if weighted:
            y_diff = loss_weight * sum_y / sum_wy
            x_diff = loss_weight * sum_x / sum_wx
        else:
            # Analytic denominators for the no-weight path (no ones array).
            # NaN when H == 1 or W == 1, matching PyTorch's empty-mean behavior.
            y_diff = loss_weight * sum_y / float(P * (H - 1) * W)
            x_diff = loss_weight * sum_x / float(P * H * (W - 1))
    else:  # 'sum'
        y_diff = loss_weight * sum_y
        x_diff = loss_weight * sum_x

    return (x_diff + y_diff).astype(jnp.float32)


def _reference_tv_loss(pred, weight=None, loss_weight=1.0, reduction="mean"):
    # Plain-JAX reference mirroring the PyTorch code path (for verification).
    y_l = jnp.abs(pred[:, :, :-1, :] - pred[:, :, 1:, :])
    x_l = jnp.abs(pred[:, :, :, :-1] - pred[:, :, :, 1:])
    if weight is not None:
        wy = weight[:, :, :-1, :]
        wx = weight[:, :, :, :-1]
        y_l = y_l * wy
        x_l = x_l * wx
        if reduction == "mean":
            y_d = y_l.sum() / wy.sum()
            x_d = x_l.sum() / wx.sum()
        else:
            y_d = y_l.sum()
            x_d = x_l.sum()
    else:
        if reduction == "mean":
            y_d = y_l.mean()
            x_d = x_l.mean()
        else:
            y_d = y_l.sum()
            x_d = x_l.sum()
    return loss_weight * x_d + loss_weight * y_d


if __name__ == "__main__":
    key = jax.random.PRNGKey(0)
    k1, k2 = jax.random.split(key)

    N, C, H, W = 2, 4, 16, 16
    pred = jax.random.normal(k1, (N, C, H, W), dtype=jnp.float32)
    weight = jax.random.uniform(k2, (N, C, H, W), dtype=jnp.float32)

    checks = []  # (got, want, tol)

    # 1) Module defaults: no weight, mean reduction (single-block grid).
    checks.append((weighted_tv_loss(pred),
                   _reference_tv_loss(pred), 1e-5))
    # 2) Element-wise weight, mean reduction.
    checks.append((weighted_tv_loss(pred, weight=weight),
                   _reference_tv_loss(pred, weight), 1e-5))
    # 3) Sum reduction with non-unit loss weight.
    checks.append((weighted_tv_loss(pred, weight=weight, loss_weight=0.5,
                                    reduction="sum"),
                   _reference_tv_loss(pred, weight, 0.5, "sum"), 1e-4))
    # 4) Force the plane- + H-tiled path (multi-step grid + glue boundary term).
    checks.append((weighted_tv_loss(pred, weight=weight,
                                    budget_bytes=768, min_block_bytes=1),
                   _reference_tv_loss(pred, weight), 1e-5))
    # 5) Same, unweighted fast path.
    checks.append((weighted_tv_loss(pred, budget_bytes=768, min_block_bytes=1),
                   _reference_tv_loss(pred), 1e-5))
    # 6) bf16 inputs: neighbor diffs taken natively in bf16 (v6e/v7x VPU path).
    pred_bf16 = pred.astype(jnp.bfloat16)
    checks.append((weighted_tv_loss(pred_bf16),
                   _reference_tv_loss(pred_bf16.astype(jnp.float32)), 2e-2))

    for i, (got, want, tol) in enumerate(checks):
        got = jax.block_until_ready(got)
        assert jnp.allclose(got, want, rtol=tol, atol=tol), (i, got, want)

    print("KERNEL_OK")
</pallas_src>

<mosaic_0001>
module attributes {stable_mosaic.version = 11 : i64} {
  func.func @_tv_partials_kernel(%arg0: i32, %arg1: i32, %arg2: memref<8x16x16xf32, #tpu.memory_space<vmem>>, %arg3: memref<1x1x8x128xf32, #tpu.memory_space<vmem>>) attributes {dimension_semantics = [#tpu.dimension_semantics<parallel>, #tpu.dimension_semantics<parallel>], iteration_bounds = array<i64: 1, 1>, scalar_prefetch = 0 : i64, scratch_operands = 0 : i64, tpu.core_type = #tpu.core_type<tc>, window_params = [{transform_indices = @transform_0, window_bounds = array<i64: 8, 16, 16>}, {transform_indices = @transform_1, window_bounds = array<i64: 1, 1, 8, 128>}]} {
    %c0 = arith.constant 0 : index
    %c0_0 = arith.constant 0 : index
    %c0_1 = arith.constant 0 : index
    %0 = vector.load %arg2[%c0, %c0_0, %c0_1] : memref<8x16x16xf32, #tpu.memory_space<vmem>>, vector<8x16x16xf32>
    %1 = vector.extract_strided_slice %0 {offsets = [0, 0, 0], sizes = [8, 15, 16], strides = [1, 1, 1]} : vector<8x16x16xf32> to vector<8x15x16xf32>
    %2 = vector.extract_strided_slice %0 {offsets = [0, 1, 0], sizes = [8, 15, 16], strides = [1, 1, 1]} : vector<8x16x16xf32> to vector<8x15x16xf32>
    %3 = arith.subf %1, %2 : vector<8x15x16xf32>
    %4 = math.absf %3 : vector<8x15x16xf32>
    %5 = vector.shape_cast %4 : vector<8x15x16xf32> to vector<1x8x15x16xf32>
    %cst = arith.constant dense<0.000000e+00> : vector<1xf32>
    %6 = vector.multi_reduction <add>, %5, %cst [1, 2, 3] : vector<1x8x15x16xf32> to vector<1xf32>
    %7 = vector.shape_cast %6 : vector<1xf32> to vector<1x1x1x1xf32>
    %8 = vector.extract %7[0, 0, 0, 0] : f32 from vector<1x1x1x1xf32>
    %9 = vector.extract_strided_slice %0 {offsets = [0, 0, 0], sizes = [8, 16, 15], strides = [1, 1, 1]} : vector<8x16x16xf32> to vector<8x16x15xf32>
    %10 = vector.extract_strided_slice %0 {offsets = [0, 0, 1], sizes = [8, 16, 15], strides = [1, 1, 1]} : vector<8x16x16xf32> to vector<8x16x15xf32>
    %11 = arith.subf %9, %10 : vector<8x16x15xf32>
    %12 = math.absf %11 : vector<8x16x15xf32>
    %13 = vector.shape_cast %12 : vector<8x16x15xf32> to vector<1x8x16x15xf32>
    %cst_2 = arith.constant dense<0.000000e+00> : vector<1xf32>
    %14 = vector.multi_reduction <add>, %13, %cst_2 [1, 2, 3] : vector<1x8x16x15xf32> to vector<1xf32>
    %15 = vector.shape_cast %14 : vector<1xf32> to vector<1x1x1x1xf32>
    %16 = vector.extract %15[0, 0, 0, 0] : f32 from vector<1x1x1x1xf32>
    %17 = tpu.iota {dimensions = array<i32: 1>} : vector<8x128xi32>
    %c0_i32 = arith.constant 0 : i32
    %18 = vector.broadcast %c0_i32 : i32 to vector<8x128xi32>
    %19 = arith.cmpi eq, %17, %18 : vector<8x128xi32>
    %cst_3 = arith.constant 0.000000e+00 : f32
    %20 = vector.broadcast %8 : f32 to vector<8x128xf32>
    %21 = vector.broadcast %cst_3 : f32 to vector<8x128xf32>
    %22 = arith.select %19, %20, %21 : vector<8x128xi1>, vector<8x128xf32>
    %c1_i32 = arith.constant 1 : i32
    %23 = vector.broadcast %c1_i32 : i32 to vector<8x128xi32>
    %24 = arith.cmpi eq, %17, %23 : vector<8x128xi32>
    %cst_4 = arith.constant 0.000000e+00 : f32
    %25 = vector.broadcast %16 : f32 to vector<8x128xf32>
    %26 = vector.broadcast %cst_4 : f32 to vector<8x128xf32>
    %27 = arith.select %24, %25, %26 : vector<8x128xi1>, vector<8x128xf32>
    %28 = arith.addf %22, %27 : vector<8x128xf32>
    %c0_5 = arith.constant 0 : index
    %c0_6 = arith.constant 0 : index
    %c0_7 = arith.constant 0 : index
    %c0_8 = arith.constant 0 : index
    %29 = vector.load %arg3[%c0_5, %c0_6, %c0_7, %c0_8] : memref<1x1x8x128xf32, #tpu.memory_space<vmem>>, vector<1x1x8x128xf32>
    %30 = vector.shape_cast %29 : vector<1x1x8x128xf32> to vector<8x128xf32>
    %31 = vector.shape_cast %28 : vector<8x128xf32> to vector<1x1x8x128xf32>
    tpu.vector_store %arg3[%c0_5, %c0_6, %c0_7, %c0_8], %31 {strides = array<i32>} : memref<1x1x8x128xf32, #tpu.memory_space<vmem>>, vector<1x1x8x128xf32>,
    return
  }
  func.func @transform_0(%arg0: i32, %arg1: i32) -> (i32, i32, i32) {
    %c0_i32 = arith.constant 0 : i32
    %c0_i32_0 = arith.constant 0 : i32
    return %arg0, %arg1, %c0_i32 : i32, i32, i32
  }
  func.func @transform_1(%arg0: i32, %arg1: i32) -> (i32, i32, i32, i32) {
    %c0_i32 = arith.constant 0 : i32
    %c0_i32_0 = arith.constant 0 : i32
    %c0_i32_1 = arith.constant 0 : i32
    return %arg0, %arg1, %c0_i32, %c0_i32_0 : i32, i32, i32, i32
  }
}

</mosaic_0001>

<bundles_post_ra>
// kernel: tpu_custom_call.1
= control target key start
LH: loop header
LB: loop body
LE: loop exit
PB: predicated region body
PF: predicated region fallthrough
CT: control target
= control target key end

     0   :  { %6 = vsyncpa [#allocation3], 0  ;;  %s564_s0 = inlined_call_operand.hbm [shape: f32[8,16,16], index: 0, kind: input, shape index: {}]   ;;  %s565_s1 = inlined_call_operand.hbm [shape: f32[1,1,8,128], index: 1, kind: output, shape index: {}]  }
   0x1   :  { %7 = vsyncpa [#allocation4], 0  ;;  %s373_s6 = smov [#allocation2]   ;;  %s325_s10 = scalar_lea.hbm %s564_s0, 2048 }
   0x2   :  { %s13_s7 = sshll.u32 %s373_s6, 4  ;;  %p326_p0 = scmp.ne.s32.totalorder %s564_s0, %s325_s10  ;;  %s14_s7 = int_to_ptr.vmem [resolvable:$true] %s13_s7 }
   0x3   :  { %p329_p1 = scmp.lt.u32.totalorder %s325_s10, %s564_s0 }
   0x5   :  { %p331_p2 = pnand %p329_p1, %p326_p0 }
   0x7   :  { %334 = shalt.err (!%p331_p2)
}
   0x8   :  { %s335_s15 = scalar_lea.vmem %s14_s7, 2048  ;;  %p340_p4 = scmp.lt.s32.totalorder %s14_s7, %s14_s7 }
   0x9   :  { %p336_p3 = scmp.ne.s32.totalorder %s14_s7, %s335_s15  ;;  %p341_p5 = scmp.lt.s32.totalorder %s335_s15, %s335_s15 }
   0xb   :  { %p342_p6 = por %p341_p5, %p340_p4 }
   0xd   :  { %p343_p7 = pnand %p342_p6, %p336_p3 }
   0xf   :  { %346 = shalt.err (!%p343_p7)
}
  0x10   :  { %s374_s16 = smov 128   ;;  %s375_s17 = smov 8  }
  0x11   :  { %19 = dma.hbm_to_vmem [thread:$0]  %s564_s0, 2048, %s14_s7, [#allocation3], %s374_s16, %s374_s16, %s375_s17  }
  0x12   :  { %369 = dma.done.wait [#allocation3], 2048  }
  0x13   :  { %370 = vsyncadd [#allocation3], 4294965248  ;;  %v400_v0 = vld [vmem:[#allocation2] sm:$0xff]  ;;  %v402_v1 = vld [vmem:[#allocation2 + $0x10] sm:$0xff]  ;;  %vm55_vm0 = vcmask 1046528   ;;  %s376_s20 = smov 127  }
  0x14   :  { %v404_v2 = vld [vmem:[#allocation2 + $0x8] sm:$0xff]  ;;  %170 = vrot.lane.b32.xlu0 %v400_v0, %s376_s20  ;;  %v56_v3 = vrot.slane %v400_v0, 1  ;;  %174 = vrot.lane.b32.xlu1 %v402_v1, %s376_s20  ;;  %v59_v4 = vrot.slane %v402_v1, 1  ;;  %v413_v6 = vld [vmem:[#allocation2 + $0x18] sm:$0xff]  ;;  %v415_v7 = vld [vmem:[#allocation2 + $0x20] sm:$0xff]  ;;  %vm130_vm1 = vcmask 129024  }
  0x15   :  { %v57_v5 = vrot.slane %v404_v2, 1  ;;  %v417_v8 = vld [vmem:[#allocation2 + $0x28] sm:$0xff]  ;;  %v60_v9 = vrot.slane %v413_v6, 1  ;;  %v62_v10 = vrot.slane %v415_v7, 1  ;;  %v422_v12 = vld [vmem:[#allocation2 + $0x30] sm:$0xff]  ;;  %v424_v13 = vld [vmem:[#allocation2 + $0x38] sm:$0xff] }
  0x16   :  { %v63_v11 = vrot.slane %v417_v8, 1  ;;  %v65_v16 = vrot.slane %v422_v12, 1  ;;  %v66_v17 = vrot.slane %v424_v13, 1  ;;  %vm128_vm2 = vcmask 130048   ;;  %v450_v36 = vld [vmem:[#allocation2 + $0x40] sm:$0xff]  ;;  %v452_v37 = vld [vmem:[#allocation2 + $0x48] sm:$0xff] }
  0x17   :  { %v97_v14 = vsub.f32 %v404_v2, %v57_v5  ;;  %v58_v15 = vsel %vm55_vm0, %v56_v3, %v57_v5  ;;  %v99_v19 = vsub.f32 %v413_v6, %v60_v9  ;;  %v61_v20 = vsel %vm55_vm0, %v59_v4, %v60_v9  ;;  %v471_v54 = vld [vmem:[#allocation2 + $0x50] sm:$0xff]  ;;  %v473_v55 = vld [vmem:[#allocation2 + $0x58] sm:$0xff]  ;;  %v484_v63 = vld [vmem:[#allocation2 + $0x60] sm:$0xff]  ;;  %s377_s22 = smov [#allocation5]  }
  0x18   :  { %v96_v18 = vsub.f32 %v400_v0, %v58_v15  ;;  %v64_v21 = vsel %vm55_vm0, %v62_v10, %v63_v11  ;;  %172 = vrot.lane.b32.xlu0 %v404_v2, %s376_s20  ;;  %176 = vrot.lane.b32.xlu1 %v413_v6, %s376_s20  ;;  %v98_v23 = vsub.f32 %v402_v1, %v61_v20  ;;  %v68_v40 = vrot.slane %v450_v36, 1  ;;  %v486_v3 = vld [vmem:[#allocation2 + $0x68] sm:$0xff]  ;;  %v496_v15 = vld [vmem:[#allocation2 + $0x70] sm:$0xff]  ;;  %s307_s23 = sshll.u32 %s377_s22, 4  ;;  %s308_s23 = int_to_ptr.vmem [resolvable:$true] %s307_s23 }
  0x19   :  { %v113_v22 = vand.u32 2147483647, %v97_v14  ;;  %v100_v24 = vsub.f32 %v415_v7, %v64_v21  ;;  %v115_v26 = vand.u32 2147483647, %v99_v19  ;;  %v101_v27 = vsub.f32 %v417_v8, %v63_v11  ;;  %s347_s24 = scalar_lea.vmem %s308_s23, 128  ;;  %p352_p9 = scmp.lt.s32.totalorder %s308_s23, %s308_s23 }
  0x1a   :  { %v112_v25 = vand.u32 2147483647, %v96_v18  ;;  %v67_v28 = vsel %vm55_vm0, %v65_v16, %v66_v17  ;;  %v114_v30 = vand.u32 2147483647, %v98_v23  ;;  %v69_v41 = vrot.slane %v452_v37, 1  ;;  %v498_v16 = vld [vmem:[#allocation2 + $0x78] sm:$0xff]  ;;  %p348_p8 = scmp.ne.s32.totalorder %s308_s23, %s347_s24  ;;  %p353_p10 = scmp.lt.s32.totalorder %s347_s24, %s347_s24 }
  0x1b   :  { %v131_v29 = vsel %vm130_vm1, %v113_v22, 0.0  ;;  %v116_v32 = vand.u32 2147483647, %v100_v24  ;;  %v102_v35 = vsub.f32 %v422_v12, %v67_v28  ;;  %v135_v38 = vsel %vm130_vm1, %v115_v26, 0.0 }
  0x1c   :  { %v129_v31 = vsel %vm128_vm2, %v112_v25, 0.0  ;;  %v133_v34 = vsel %vm128_vm2, %v114_v30, 0.0  ;;  %178 = vrot.lane.b32.xlu0 %v415_v7, %s376_s20  ;;  %180 = vrot.lane.b32.xlu1 %v417_v8, %s376_s20  ;;  %v117_v39 = vand.u32 2147483647, %v101_v27  ;;  %v103_v45 = vsub.f32 %v424_v13, %v66_v17  ;;  %p354_p11 = por %p353_p10, %p352_p9 }
  0x1d   :  { %v132_v33 = vadd.f32 %v131_v29, %v129_v31  ;;  %v137_v43 = vsel %vm128_vm2, %v116_v32, 0.0  ;;  %v118_v46 = vand.u32 2147483647, %v102_v35  ;;  %v70_v48 = vsel %vm55_vm0, %v68_v40, %v69_v41 }
  0x1e   :  { %v139_v47 = vsel %vm130_vm1, %v117_v39, 0.0  ;;  %v119_v51 = vand.u32 2147483647, %v103_v45  ;;  %v104_v53 = vsub.f32 %v450_v36, %v70_v48  ;;  %v71_v56 = vrot.slane %v471_v54, 1  ;;  %p355_p12 = pnand %p354_p11, %p348_p8 }
  0x1f   :  { %v134_v42 = vadd.f32 %v133_v34, %v132_v33  ;;  %v141_v52 = vsel %vm128_vm2, %v118_v46, 0.0  ;;  %v72_v57 = vrot.slane %v473_v55, 1  ;;  %v105_v60 = vsub.f32 %v452_v37, %v69_v41 }
  0x20   :  { %182 = vrot.lane.b32.xlu0 %v422_v12, %s376_s20  ;;  %184 = vrot.lane.b32.xlu1 %v424_v13, %s376_s20  ;;  %v143_v59 = vsel %vm130_vm1, %v119_v51, 0.0  ;;  %v120_v61 = vand.u32 2147483647, %v104_v53  ;;  %v74_v11 = vrot.slane %v484_v63, 1  ;;  %v75_v14 = vrot.slane %v486_v3, 1 }
  0x21   :  { %v136_v44 = vadd.f32 %v135_v38, %v134_v42  ;;  %v73_v62 = vsel %vm55_vm0, %v71_v56, %v72_v57  ;;  %v121_v5 = vand.u32 2147483647, %v105_v60  ;;  %v107_v19 = vsub.f32 %v473_v55, %v72_v57 }
  0x22   :  { %v145_v9 = vsel %vm128_vm2, %v120_v61, 0.0  ;;  %v106_v10 = vsub.f32 %v471_v54, %v73_v62  ;;  %v76_v21 = vsel %vm55_vm0, %v74_v11, %v75_v14  ;;  %v77_v26 = vrot.slane %v496_v15, 1 }
  0x23   :  { %v138_v49 = vadd.f32 %v137_v43, %v136_v44  ;;  %v147_v18 = vsel %vm130_vm1, %v121_v5, 0.0  ;;  %v123_v23 = vand.u32 2147483647, %v107_v19  ;;  %v108_v24 = vsub.f32 %v484_v63, %v76_v21 }
  0x24   :  { %186 = vrot.lane.b32.xlu0 %v450_v36, %s376_s20  ;;  %188 = vrot.lane.b32.xlu1 %v452_v37, %s376_s20  ;;  %v122_v20 = vand.u32 2147483647, %v106_v10  ;;  %v78_v27 = vrot.slane %v498_v16, 1  ;;  %v109_v30 = vsub.f32 %v486_v3, %v75_v14  ;;  %vm250_vm3 = vcmask 121856  }
  0x25   :  { %v140_v50 = vadd.f32 %v139_v47, %v138_v49  ;;  %v151_v29 = vsel %vm130_vm1, %v123_v23, 0.0  ;;  %v124_v31 = vand.u32 2147483647, %v108_v24 }
  0x26   :  { %v149_v25 = vsel %vm128_vm2, %v122_v20, 0.0  ;;  %v79_v32 = vsel %vm55_vm0, %v77_v26, %v78_v27  ;;  %v125_v34 = vand.u32 2147483647, %v109_v30  ;;  %v111_v40 = vsub.f32 %v498_v16, %v78_v27 }
  0x27   :  { %v142_v58 = vadd.f32 %v141_v52, %v140_v50  ;;  %v110_v35 = vsub.f32 %v496_v15, %v79_v32  ;;  %v153_v38 = vsel %vm128_vm2, %v124_v31, 0.0 }
  0x28   :  { %190 = vrot.lane.b32.xlu0 %v471_v54, %s376_s20  ;;  %192 = vrot.lane.b32.xlu1 %v473_v55, %s376_s20  ;;  %v155_v42 = vsel %vm130_vm1, %v125_v34, 0.0  ;;  %v127_v44 = vand.u32 2147483647, %v111_v40 }
  0x29   :  { %v144_v4 = vadd.f32 %v143_v59, %v142_v58  ;;  %v126_v41 = vand.u32 2147483647, %v110_v35 }
  0x2a   :  { %v159_v47 = vsel %vm130_vm1, %v127_v44, 0.0 }
  0x2b   :  { %v146_v17 = vadd.f32 %v145_v9, %v144_v4  ;;  %v157_v45 = vsel %vm128_vm2, %v126_v41, 0.0 }
  0x2c   :  { %194 = vrot.lane.b32.xlu0 %v484_v63, %s376_s20  ;;  %196 = vrot.lane.b32.xlu1 %v486_v3, %s376_s20 }
  0x2d   :  { %v148_v22 = vadd.f32 %v147_v18, %v146_v17 }
  0x2f   :  { %v150_v28 = vadd.f32 %v149_v25, %v148_v22 }
  0x30   :  { %198 = vrot.lane.b32.xlu0 %v496_v15, %s376_s20  ;;  %200 = vrot.lane.b32.xlu1 %v498_v16, %s376_s20 }
  0x31   :  { %v152_v33 = vadd.f32 %v151_v29, %v150_v28 }
  0x33   :  { %v154_v39 = vadd.f32 %v153_v38, %v152_v33 }
  0x35   :  { %v156_v43 = vadd.f32 %v155_v42, %v154_v39 }
  0x37   :  { %v158_v46 = vadd.f32 %v157_v45, %v156_v43 }
  0x39   :  { %v160_v48 = vadd.f32 %v159_v47, %v158_v46 }
  0x4f   :  { %161 = vadd.xlane.f32.xlu0 %v160_v48 }
  0x86   :  { %v171_v49 = vpop.permute.xlu0 %170  ;;  %v175_v50 = vpop.permute.xlu1 %174 }
  0x87   :  { %v218_v51 = vsub.f32 %v400_v0, %v171_v49  ;;  %v220_v52 = vsub.f32 %v402_v1, %v175_v50 }
  0x89   :  { %v234_v57 = vand.u32 2147483647, %v218_v51  ;;  %v236_v60 = vand.u32 2147483647, %v220_v52 }
  0x8a   :  { %v173_v53 = vpop.permute.xlu0 %172  ;;  %v177_v56 = vpop.permute.xlu1 %176 }
  0x8b   :  { %v219_v58 = vsub.f32 %v404_v2, %v173_v53  ;;  %v221_v59 = vsub.f32 %v413_v6, %v177_v56  ;;  %v251_v9 = vsel %vm250_vm3, %v234_v57, 0.0  ;;  %v254_v14 = vsel %vm250_vm3, %v236_v60, 0.0 }
  0x8d   :  { %v235_v61 = vand.u32 2147483647, %v219_v58  ;;  %v237_v62 = vand.u32 2147483647, %v221_v59 }
  0x8e   :  { %v179_v4 = vpop.permute.xlu0 %178  ;;  %v181_v5 = vpop.permute.xlu1 %180 }
  0x8f   :  { %v252_v10 = vsel %vm250_vm3, %v235_v61, 0.0  ;;  %v222_v0 = vsub.f32 %v415_v7, %v179_v4  ;;  %v223_v1 = vsub.f32 %v417_v8, %v181_v5  ;;  %v256_v2 = vsel %vm250_vm3, %v237_v62, 0.0 }
  0x90   :  { %v253_v11 = vadd.f32 %v252_v10, %v251_v9 }
  0x91   :  { %v238_v6 = vand.u32 2147483647, %v222_v0  ;;  %v239_v17 = vand.u32 2147483647, %v223_v1 }
  0x92   :  { %v255_v18 = vadd.f32 %v254_v14, %v253_v11  ;;  %v183_v19 = vpop.permute.xlu0 %182  ;;  %v185_v20 = vpop.permute.xlu1 %184 }
  0x93   :  { %v258_v21 = vsel %vm250_vm3, %v238_v6, 0.0  ;;  %v224_v22 = vsub.f32 %v422_v12, %v183_v19  ;;  %v225_v23 = vsub.f32 %v424_v13, %v185_v20  ;;  %v260_v7 = vsel %vm250_vm3, %v239_v17, 0.0 }
  0x94   :  { %v257_v24 = vadd.f32 %v256_v2, %v255_v18 }
  0x95   :  { %v240_v8 = vand.u32 2147483647, %v224_v22  ;;  %v241_v25 = vand.u32 2147483647, %v225_v23 }
  0x96   :  { %v259_v26 = vadd.f32 %v258_v21, %v257_v24  ;;  %v187_v27 = vpop.permute.xlu0 %186  ;;  %v189_v28 = vpop.permute.xlu1 %188  ;;  %v291_v24 = vlaneseq }
  0x97   :  { %v262_v29 = vsel %vm250_vm3, %v240_v8, 0.0  ;;  %v226_v30 = vsub.f32 %v450_v36, %v187_v27  ;;  %v227_v31 = vsub.f32 %v452_v37, %v189_v28  ;;  %v264_v33 = vsel %vm250_vm3, %v241_v25, 0.0 }
  0x98   :  { %v261_v32 = vadd.f32 %v260_v7, %v259_v26  ;;  %v292_v7 = vand.u32 127, %v291_v24 }
  0x99   :  { %v242_v12 = vand.u32 2147483647, %v226_v30  ;;  %v243_v34 = vand.u32 2147483647, %v227_v31 }
  0x9a   :  { %v263_v13 = vadd.f32 %v262_v29, %v261_v32  ;;  %v191_v35 = vpop.permute.xlu0 %190  ;;  %v193_v38 = vpop.permute.xlu1 %192  ;;  %vm293_vm4 = vcmp.eq.s32.totalorder %v292_v7, 0  ;;  %vm296_vm5 = vcmp.eq.s32.totalorder %v292_v7, 1 }
  0x9b   :  { %v266_v39 = vsel %vm250_vm3, %v242_v12, 0.0  ;;  %v228_v40 = vsub.f32 %v471_v54, %v191_v35  ;;  %v229_v41 = vsub.f32 %v473_v55, %v193_v38  ;;  %v268_v43 = vsel %vm250_vm3, %v243_v34, 0.0 }
  0x9c   :  { %v265_v42 = vadd.f32 %v264_v33, %v263_v13 }
  0x9d   :  { %v244_v36 = vand.u32 2147483647, %v228_v40  ;;  %v245_v44 = vand.u32 2147483647, %v229_v41 }
  0x9e   :  { %v267_v37 = vadd.f32 %v266_v39, %v265_v42  ;;  %v195_v45 = vpop.permute.xlu0 %194  ;;  %v197_v46 = vpop.permute.xlu1 %196 }
  0x9f   :  { %v270_v47 = vsel %vm250_vm3, %v244_v36, 0.0  ;;  %v230_v48 = vsub.f32 %v484_v63, %v195_v45  ;;  %v231_v49 = vsub.f32 %v486_v3, %v197_v46  ;;  %v272_v51 = vsel %vm250_vm3, %v245_v44, 0.0 }
  0xa0   :  { %v269_v50 = vadd.f32 %v268_v43, %v267_v37 }
  0xa1   :  { %v246_v54 = vand.u32 2147483647, %v230_v48  ;;  %v247_v52 = vand.u32 2147483647, %v231_v49 }
  0xa2   :  { %v271_v55 = vadd.f32 %v270_v47, %v269_v50  ;;  %v199_v53 = vpop.permute.xlu0 %198  ;;  %v201_v56 = vpop.permute.xlu1 %200 }
  0xa3   :  { %v274_v57 = vsel %vm250_vm3, %v246_v54, 0.0  ;;  %v232_v58 = vsub.f32 %v496_v15, %v199_v53  ;;  %v233_v59 = vsub.f32 %v498_v16, %v201_v56  ;;  %v276_v61 = vsel %vm250_vm3, %v247_v52, 0.0 }
  0xa4   :  { %v273_v60 = vadd.f32 %v272_v51, %v271_v55 }
  0xa5   :  { %v248_v63 = vand.u32 2147483647, %v232_v58  ;;  %v249_v62 = vand.u32 2147483647, %v233_v59 }
  0xa6   :  { %v275_v3 = vadd.f32 %v274_v57, %v273_v60 }
  0xa7   :  { %v278_v4 = vsel %vm250_vm3, %v248_v63, 0.0  ;;  %v280_v9 = vsel %vm250_vm3, %v249_v62, 0.0 }
  0xa8   :  { %v277_v5 = vadd.f32 %v276_v61, %v275_v3 }
  0xaa   :  { %v279_v10 = vadd.f32 %v278_v4, %v277_v5 }
  0xac   :  { %v281_v0 = vadd.f32 %v280_v9, %v279_v10 }
  0xae   :  { %282 = vadd.xlane.f32.xlu1 %v281_v0 }
  0xdc   :  { %v162_v1 = vpop.xlane.xlu0 %161 }
  0xdd   :  { %v163_v11 = vrot.slane %v162_v1, 4 }
  0xdf   :  { %v164_v14 = vadd.f32 %v163_v11, %v162_v1 }
  0xe1   :  { %v165_v15 = vrot.slane %v164_v14, 2 }
  0xe3   :  { %v166_v2 = vadd.f32 %v165_v15, %v164_v14 }
  0xe5   :  { %v167_v16 = vrot.slane %v166_v2, 1 }
  0xe7   :  { %v168_v6 = vadd.f32 %v167_v16, %v166_v2 }
  0xe9   :  { %316 = vpush %v168_v6 }
 0x11a   :  { %s317_s0 = spop %316 }
 0x11b   :  { %v294_v8 = vstv %s317_s0 }
 0x11c   :  { %v295_v26 = vsel %vm293_vm4, %v294_v8, 0.0 }
 0x13b   :  { %v283_v17 = vpop.xlane.xlu1 %282 }
 0x13c   :  { %v284_v18 = vrot.slane %v283_v17, 4 }
 0x13e   :  { %v285_v19 = vadd.f32 %v284_v18, %v283_v17 }
 0x140   :  { %v286_v20 = vrot.slane %v285_v19, 2 }
 0x142   :  { %v287_v21 = vadd.f32 %v286_v20, %v285_v19 }
 0x144   :  { %v288_v22 = vrot.slane %v287_v21, 1 }
 0x146   :  { %v289_v23 = vadd.f32 %v288_v22, %v287_v21 }
 0x148   :  { %318 = vpush %v289_v23 }
 0x179   :  { %s319_s21 = spop %318 }
 0x17a   :  { %v297_v25 = vstv %s319_s21 }
 0x17b   :  { %v298_v27 = vsel %vm296_vm5, %v297_v25, 0.0 }
 0x17c   :  { %v299_v28 = vadd.f32 %v298_v27, %v295_v26 }
 0x17e   :  { %300 = vst [vmem:[#allocation5] sm:$0xff] %v299_v28 }
 0x17f   :  { %358 = shalt.err (!%p355_p12)
}
 0x180   :  { %s359_s27 = scalar_lea.hbm %s565_s1, 128 }
 0x181   :  { %p360_p13 = scmp.ne.s32.totalorder %s565_s1, %s359_s27  ;;  %p363_p0 = scmp.lt.u32.totalorder %s359_s27, %s565_s1 }
 0x183   :  { %p365_p1 = pnand %p363_p0, %p360_p13 }
 0x185   :  { %368 = shalt.err (!%p365_p1)
}
 0x186   :  { %310 = dma.vmem_to_hbm [thread:$0]  %s308_s23, 128, %s565_s1, [#allocation4]  }
 0x187   :  { %371 = dma.done.wait [#allocation4], 128  }
 0x188   :  { %372 = vsyncadd [#allocation4], 4294967168 }
 0x189   :  { %314 = vsyncpa [#allocation3], 1 }
 0x18a   :  { %315 = vsyncpa [#allocation4], 1 }

</bundles_post_ra>
